<compile_context>
chip_gen: v5e
topology: v5e:2x2
jax: 0.10.0
libtpu: 0.0.40
codegen_flags: <defaults>
</compile_context>

<pallas_src>
import functools

import jax
import jax.numpy as jnp
import numpy as np
from jax.experimental import pallas as pl
from jax.experimental.pallas import tpu as pltpu


def _to_predictions_kernel(priors_ref, conf_ref, loc_ref,
                           conf_out_ref, box_out_ref,
                           *, center_variance, size_variance):
    # ---- softmax over the class dim (minor / lane axis) ----
    conf = conf_ref[...].astype(jnp.float32)               # (1, TP, C)
    m = jnp.max(conf, axis=-1, keepdims=True)              # (1, TP, 1)
    e = jnp.exp(conf - m)
    denom = jnp.sum(e, axis=-1, keepdims=True)             # (1, TP, 1)
    conf_out_ref[...] = (e / denom).astype(conf_out_ref.dtype)

    # ---- decode locations -> center-form -> corner-form boxes ----
    # Everything is row-local over the prior axis, so garbage rows in a ragged
    # last block stay contained (their output rows are dropped by Pallas).
    loc = loc_ref[...].astype(jnp.float32)                  # (1, TP, 4)
    pri = priors_ref[...].astype(jnp.float32)[None]         # (1, TP, 4)

    loc_xy = loc[..., 0:2]                                   # (1, TP, 2)
    loc_wh = loc[..., 2:4]
    pri_xy = pri[..., 0:2]
    pri_wh = pri[..., 2:4]

    # center form: (cx, cy) = loc_xy * cv * prior_wh + prior_xy
    #              (w,  h ) = exp(loc_wh * sv) * prior_wh
    cxy = loc_xy * center_variance * pri_wh + pri_xy         # (1, TP, 2)
    wh = jnp.exp(loc_wh * size_variance) * pri_wh            # (1, TP, 2)

    # corner form: [cxy - wh/2, cxy + wh/2]
    box = jnp.concatenate([cxy - 0.5 * wh, cxy + 0.5 * wh], axis=-1)
    box_out_ref[...] = box.astype(box_out_ref.dtype)


def _vmem_estimate(tp, num_classes):
    """Rough double-buffered VMEM footprint of all per-step blocks (f32, lane-padded)."""
    lanes_c = ((num_classes + 127) // 128) * 128
    rows = ((tp + 7) // 8) * 8
    # conf in + conf out (C lanes each) + loc + priors + box (128-lane-padded 4-wide)
    per_step = rows * 4 * (2 * lanes_c + 3 * 128)
    return 2 * per_step


def _choose_tile_p(P, num_classes, tile_p):
    if P <= tile_p:
        tp = P                                   # full-P block is always legal
    else:
        tp = max(8, (tile_p // 8) * 8)           # keep second-minor a multiple of 8
    # Clamp so the (lane-padded) double-buffered working set stays well under
    # every generation's scoped-VMEM ceiling.
    budget = 36 * 1024 * 1024
    while _vmem_estimate(tp, num_classes) > budget and tp > 512:
        tp = max(8, ((tp // 2 + 7) // 8) * 8)
    return tp


def to_predictions(confidences, locations, priors,
                   center_variance, size_variance, *, tile_p=4096):
    B, P, C = confidences.shape
    assert locations.shape == (B, P, 4)
    assert priors.shape == (P, 4)

    TP = _choose_tile_p(P, C, tile_p)
    grid = (pl.cdiv(P, TP), B)    # p outer, b inner -> priors block stays resident

    vmem_limit = None
    est = _vmem_estimate(TP, C)
    if est > 14 * 1024 * 1024:
        # Raise the scoped-VMEM limit for big tiles; stays < v7x's 64 MiB physical.
        vmem_limit = min(48 * 1024 * 1024, est + 8 * 1024 * 1024)

    kernel = functools.partial(_to_predictions_kernel,
                               center_variance=float(center_variance),
                               size_variance=float(size_variance))

    conf_out, boxes = pl.pallas_call(
        kernel,
        out_shape=(
            jax.ShapeDtypeStruct((B, P, C), confidences.dtype),
            jax.ShapeDtypeStruct((B, P, 4), locations.dtype),
        ),
        grid=grid,
        in_specs=[
            pl.BlockSpec((TP, 4), lambda p, b: (p, 0)),         # priors (batch-invariant)
            pl.BlockSpec((1, TP, C), lambda p, b: (b, p, 0)),   # confidences
            pl.BlockSpec((1, TP, 4), lambda p, b: (b, p, 0)),   # locations
        ],
        out_specs=(
            pl.BlockSpec((1, TP, C), lambda p, b: (b, p, 0)),
            pl.BlockSpec((1, TP, 4), lambda p, b: (b, p, 0)),
        ),
        compiler_params=pltpu.CompilerParams(
            dimension_semantics=("parallel", "parallel"),
            vmem_limit_bytes=vmem_limit),
    )(priors, confidences, locations)

    return conf_out, boxes


def _reference(confidences, locations, priors, center_variance, size_variance):
    # Pure-JAX reference mirroring the PyTorch box_utils semantics.
    conf = jax.nn.softmax(confidences.astype(jnp.float32), axis=2)
    pri = priors[None].astype(jnp.float32)
    loc = locations.astype(jnp.float32)
    cxy = loc[..., :2] * center_variance * pri[..., 2:] + pri[..., :2]
    wh = jnp.exp(loc[..., 2:] * size_variance) * pri[..., 2:]
    boxes = jnp.concatenate([cxy - wh / 2.0, cxy + wh / 2.0], axis=-1)
    return conf, boxes


def _make_inputs(key, B, P, C):
    k1, k2, k3, k4 = jax.random.split(key, 4)
    confidences = jax.random.normal(k1, (B, P, C), dtype=jnp.float32)
    locations = jax.random.normal(k2, (B, P, 4), dtype=jnp.float32)
    prior_xy = jax.random.uniform(k3, (P, 2), minval=0.05, maxval=0.95)
    prior_wh = jax.random.uniform(k4, (P, 2), minval=0.05, maxval=0.50)
    priors = jnp.concatenate([prior_xy, prior_wh], axis=-1).astype(jnp.float32)
    return confidences, locations, priors


def _check(confidences, locations, priors, cv, sv, **kw):
    conf_out, boxes_out = to_predictions(confidences, locations, priors, cv, sv, **kw)
    jax.block_until_ready((conf_out, boxes_out))
    conf_ref, boxes_ref = _reference(confidences, locations, priors, cv, sv)
    np.testing.assert_allclose(np.asarray(conf_out), np.asarray(conf_ref),
                               rtol=1e-5, atol=1e-5)
    np.testing.assert_allclose(np.asarray(boxes_out), np.asarray(boxes_ref),
                               rtol=1e-5, atol=1e-5)


if __name__ == "__main__":
    center_variance = 0.1
    size_variance = 0.2
    key = jax.random.PRNGKey(0)
    k_small, k_big = jax.random.split(key)

    # Small test (single tile per batch element).
    conf, loc, pri = _make_inputs(k_small, B=2, P=16, C=8)
    _check(conf, loc, pri, center_variance, size_variance)

    # Multi-tile + ragged last block test (P not a multiple of the tile).
    conf, loc, pri = _make_inputs(k_big, B=2, P=300, C=21)
    _check(conf, loc, pri, center_variance, size_variance, tile_p=128)

    print("KERNEL_OK")
</pallas_src>

<mosaic_0001>
module attributes {stable_mosaic.version = 11 : i64} {
  func.func @_to_predictions_kernel(%arg0: i32, %arg1: i32, %arg2: memref<16x4xf32, #tpu.memory_space<vmem>>, %arg3: memref<1x16x8xf32, #tpu.memory_space<vmem>>, %arg4: memref<1x16x4xf32, #tpu.memory_space<vmem>>, %arg5: memref<1x16x8xf32, #tpu.memory_space<vmem>>, %arg6: memref<1x16x4xf32, #tpu.memory_space<vmem>>) attributes {dimension_semantics = [#tpu.dimension_semantics<parallel>, #tpu.dimension_semantics<parallel>], iteration_bounds = array<i64: 1, 2>, scalar_prefetch = 0 : i64, scratch_operands = 0 : i64, tpu.core_type = #tpu.core_type<tc>, window_params = [{transform_indices = @transform_0, window_bounds = array<i64: 16, 4>}, {transform_indices = @transform_1, window_bounds = array<i64: 1, 16, 8>}, {transform_indices = @transform_2, window_bounds = array<i64: 1, 16, 4>}, {transform_indices = @transform_3, window_bounds = array<i64: 1, 16, 8>}, {transform_indices = @transform_4, window_bounds = array<i64: 1, 16, 4>}]} {
    %c0 = arith.constant 0 : index
    %c0_0 = arith.constant 0 : index
    %c0_1 = arith.constant 0 : index
    %0 = vector.load %arg3[%c0, %c0_0, %c0_1] : memref<1x16x8xf32, #tpu.memory_space<vmem>>, vector<1x16x8xf32>
    %cst = arith.constant dense<0xFF800000> : vector<1x16xf32>
    %1 = vector.multi_reduction <maximumf>, %0, %cst [2] : vector<1x16x8xf32> to vector<1x16xf32>
    %2 = vector.shape_cast %1 : vector<1x16xf32> to vector<1x16x1xf32>
    %3 = vector.broadcast %2 : vector<1x16x1xf32> to vector<1x16x8xf32>
    %4 = arith.subf %0, %3 : vector<1x16x8xf32>
    %5 = math.exp %4 : vector<1x16x8xf32>
    %cst_2 = arith.constant dense<0.000000e+00> : vector<1x16xf32>
    %6 = vector.multi_reduction <add>, %5, %cst_2 [2] : vector<1x16x8xf32> to vector<1x16xf32>
    %7 = vector.shape_cast %6 : vector<1x16xf32> to vector<1x16x1xf32>
    %8 = vector.broadcast %7 : vector<1x16x1xf32> to vector<1x16x8xf32>
    %9 = arith.divf %5, %8 : vector<1x16x8xf32>
    %c0_3 = arith.constant 0 : index
    %c0_4 = arith.constant 0 : index
    %c0_5 = arith.constant 0 : index
    %10 = vector.load %arg5[%c0_3, %c0_4, %c0_5] : memref<1x16x8xf32, #tpu.memory_space<vmem>>, vector<1x16x8xf32>
    tpu.vector_store %arg5[%c0_3, %c0_4, %c0_5], %9 {strides = array<i32>} : memref<1x16x8xf32, #tpu.memory_space<vmem>>, vector<1x16x8xf32>,
    %c0_6 = arith.constant 0 : index
    %c0_7 = arith.constant 0 : index
    %c0_8 = arith.constant 0 : index
    %11 = vector.load %arg4[%c0_6, %c0_7, %c0_8] : memref<1x16x4xf32, #tpu.memory_space<vmem>>, vector<1x16x4xf32>
    %c0_9 = arith.constant 0 : index
    %c0_10 = arith.constant 0 : index
    %12 = vector.load %arg2[%c0_9, %c0_10] : memref<16x4xf32, #tpu.memory_space<vmem>>, vector<16x4xf32>
    %13 = vector.shape_cast %12 : vector<16x4xf32> to vector<1x16x4xf32>
    %14 = vector.extract_strided_slice %11 {offsets = [0, 0, 0], sizes = [1, 16, 2], strides = [1, 1, 1]} : vector<1x16x4xf32> to vector<1x16x2xf32>
    %15 = vector.extract_strided_slice %11 {offsets = [0, 0, 2], sizes = [1, 16, 2], strides = [1, 1, 1]} : vector<1x16x4xf32> to vector<1x16x2xf32>
    %16 = vector.extract_strided_slice %13 {offsets = [0, 0, 0], sizes = [1, 16, 2], strides = [1, 1, 1]} : vector<1x16x4xf32> to vector<1x16x2xf32>
    %17 = vector.extract_strided_slice %13 {offsets = [0, 0, 2], sizes = [1, 16, 2], strides = [1, 1, 1]} : vector<1x16x4xf32> to vector<1x16x2xf32>
    %cst_11 = arith.constant 1.000000e-01 : f32
    %18 = vector.broadcast %cst_11 : f32 to vector<1x16x2xf32>
    %19 = arith.mulf %14, %18 : vector<1x16x2xf32>
    %20 = arith.mulf %19, %17 : vector<1x16x2xf32>
    %21 = arith.addf %20, %16 : vector<1x16x2xf32>
    %cst_12 = arith.constant 2.000000e-01 : f32
    %22 = vector.broadcast %cst_12 : f32 to vector<1x16x2xf32>
    %23 = arith.mulf %15, %22 : vector<1x16x2xf32>
    %24 = math.exp %23 : vector<1x16x2xf32>
    %25 = arith.mulf %24, %17 : vector<1x16x2xf32>
    %cst_13 = arith.constant 5.000000e-01 : f32
    %26 = vector.broadcast %cst_13 : f32 to vector<1x16x2xf32>
    %27 = arith.mulf %26, %25 : vector<1x16x2xf32>
    %28 = arith.subf %21, %27 : vector<1x16x2xf32>
    %cst_14 = arith.constant 5.000000e-01 : f32
    %29 = vector.broadcast %cst_14 : f32 to vector<1x16x2xf32>
    %30 = arith.mulf %29, %25 : vector<1x16x2xf32>
    %31 = arith.addf %21, %30 : vector<1x16x2xf32>
    %32 = tpu.concatenate %28, %31 in 2 : vector<1x16x2xf32>, vector<1x16x2xf32> -> vector<1x16x4xf32>
    %c0_15 = arith.constant 0 : index
    %c0_16 = arith.constant 0 : index
    %c0_17 = arith.constant 0 : index
    %33 = vector.load %arg6[%c0_15, %c0_16, %c0_17] : memref<1x16x4xf32, #tpu.memory_space<vmem>>, vector<1x16x4xf32>
    tpu.vector_store %arg6[%c0_15, %c0_16, %c0_17], %32 {strides = array<i32>} : memref<1x16x4xf32, #tpu.memory_space<vmem>>, vector<1x16x4xf32>,
    return
  }
  func.func @transform_0(%arg0: i32, %arg1: i32) -> (i32, i32) {
    %c0_i32 = arith.constant 0 : i32
    %c0_i32_0 = arith.constant 0 : i32
    return %arg0, %c0_i32 : i32, i32
  }
  func.func @transform_1(%arg0: i32, %arg1: i32) -> (i32, i32, i32) {
    %c0_i32 = arith.constant 0 : i32
    %c0_i32_0 = arith.constant 0 : i32
    return %arg1, %arg0, %c0_i32 : i32, i32, i32
  }
  func.func @transform_2(%arg0: i32, %arg1: i32) -> (i32, i32, i32) {
    %c0_i32 = arith.constant 0 : i32
    %c0_i32_0 = arith.constant 0 : i32
    return %arg1, %arg0, %c0_i32 : i32, i32, i32
  }
  func.func @transform_3(%arg0: i32, %arg1: i32) -> (i32, i32, i32) {
    %c0_i32 = arith.constant 0 : i32
    %c0_i32_0 = arith.constant 0 : i32
    return %arg1, %arg0, %c0_i32 : i32, i32, i32
  }
  func.func @transform_4(%arg0: i32, %arg1: i32) -> (i32, i32, i32) {
    %c0_i32 = arith.constant 0 : i32
    %c0_i32_0 = arith.constant 0 : i32
    return %arg1, %arg0, %c0_i32 : i32, i32, i32
  }
}

</mosaic_0001>

<bundles_post_ra>
// kernel: tpu_custom_call.1
= control target key start
LH: loop header
LB: loop body
LE: loop exit
PB: predicated region body
PF: predicated region fallthrough
CT: control target
= control target key end

     0   :  { %s705_s15 = smov 0   ;;  %s707_s16 = smov 0   ;;  %s770_s0 = inlined_call_operand.vmem [shape: f32[16,4], index: 0, kind: input, shape index: {}]   ;;  %s771_s1 = inlined_call_operand.vmem [shape: f32[2,16,8], index: 1, kind: input, shape index: {}]   ;;  %s772_s2 = inlined_call_operand.vmem [shape: f32[2,16,4], index: 2, kind: input, shape index: {}]   ;;  %s773_s3 = inlined_call_operand.vmem [shape: f32[2,16,8], index: 3, kind: output, shape index: {0}]   ;;  %s774_s4 = inlined_call_operand.vmem [shape: f32[2,16,4], index: 4, kind: output, shape index: {1}]  }
   0x1   :  { %s709_s17 = smov 0  }
   0x2 LB: > { %s24_s18 = sadd.s32 1, %s672_s16  ;;  %p601_p0 = scmp.ge.s32.totalorder %s676_s17, 1  ;;  %s676_s17 = sphi %s709_s17, %s15_s17   ;;  %s672_s16 = sphi %s707_s16, %s776_s16   ;;  %s668_s15 = sphi %s705_s15, %s775_s15  }
   0x3   : > { %p25_p1 = scmp.ge.s32.totalorder %s24_s18, 2  ;;  %p216_p2 = scmp.lt.s32.totalorder %s676_s17, 3 }
   0x5   : > { %s778_s18 = smov (%p25_p1, %s24_s18), 0  ;;  %p217_p3 = pnand %p601_p0, %p216_p2 }
   0x6   : > { %p280_p4 = scmp.lt.s32.totalorder (!%p217_p3), %s668_s15, 1  ;;  %s678_s21 = smov (!%p217_p3), 126  }
   0x7   : > { %220 = sbr.rel (%p217_p3) target bundleno = 289 (0x121), region = 32  ;;  %s679_s5 = smov (!%p217_p3), 2  }
   0xc   : > { %v374_v0 = vld [vmem:[%s770_s0] sm:$0xff]  ;;  %s780_s15 = smov (!%p280_p4, %s668_s15), 1  ;;  %vm321_vm0 = vcmask 64512   ;;  %v375_v1 = vld [vmem:[%s770_s0 + $0x8] sm:$0xff]  ;;  %vm420_vm1 = vcmask 15360   ;;  %vm423_vm2 = vcmask 31744  }
   0xd   : > { %380 = vrot.lane.b32.xlu1 %v374_v0, %s678_s21  ;;  %s726_s22 = sshll.u32 %s780_s15, 4 }
   0xe   : > { %s287_s25 = scalar_lea.vmem %s771_s1, %s726_s22  ;;  %s297_s28 = scalar_lea.vmem %s772_s2, %s726_s22 }
   0xf   : > { %v319_v2 = vld [vmem:[%s287_s25] sm:$0xff]  ;;  %v373_v4 = vld [vmem:[%s297_s28 + $0x8] sm:$0xff]  ;;  %s747_s8 = scalar_lea.vmem %s774_s4, %s726_s22  ;;  %s307_s11 = scalar_lea.vmem %s773_s3, %s726_s22 }
  0x10   : > { %v372_v3 = vld [vmem:[%s297_s28] sm:$0xff]  ;;  %v322_v5 = vsel %vm321_vm0, %v319_v2, -inf  ;;  %v391_v6 = vmul.f32 0.2, %v373_v4  ;;  %v320_v10 = vld [vmem:[%s287_s25 + $0x8] sm:$0xff] }
  0x11   : > { %v390_v7 = vmul.f32 0.2, %v372_v3  ;;  %323 = vmax.xlane.f32.xlu0 %v322_v5  ;;  %v325_v11 = vsel %vm321_vm0, %v320_v10, -inf  ;;  %v376_v18 = vmul.f32 0.1, %v372_v3 }
  0x12   : > { %v394_v9 = vmul.f32 1.442695, %v391_v6  ;;  %v377_v33 = vmul.f32 0.1, %v373_v4 }
  0x13   : > { %v392_v8 = vmul.f32 1.442695, %v390_v7 }
  0x15   : > { %382 = vrot.lane.b32.xlu1 %v375_v1, %s678_s21  ;;  %642 = vpow2.f32 %v392_v8 }
  0x16   : > { %644 = vpow2.f32 %v394_v9 }
  0x19   : > { %326 = vmax.xlane.f32.xlu0 %v325_v11 }
  0x1b   : > { %v643_v12 = vpop.eup %642 }
  0x1c   : > { %v396_v13 = vmul.f32 %v643_v12, %v374_v0  ;;  %v645_v14 = vpop.eup %644 }
  0x1d   : > { %v397_v16 = vmul.f32 %v645_v14, %v375_v1 }
  0x1e   : > { %v398_v15 = vmul.f32 0.5, %v396_v13 }
  0x1f   : > { %v399_v17 = vmul.f32 0.5, %v397_v16 }
  0x20   : > { %402 = vrot.lane.b32.xlu2 %v398_v15, %s678_s21 }
  0x28   : > { %404 = vrot.lane.b32.xlu2 %v399_v17, %s678_s21 }
  0x7a   : > { %v403_v21 = vpop.permute.xlu2 %402 }
  0x7f   : > { %v381_v19 = vpop.permute.xlu1 %380 }
  0x80   : > { %v386_v20 = vmul.f32 %v381_v19, %v376_v18 }
  0x82   : > { %v388_v22 = vadd.f32 %v386_v20, %v374_v0  ;;  %v405_v39 = vpop.permute.xlu2 %404 }
  0x84   : > { %v408_v23 = vsub.f32 %v388_v22, %v403_v21  ;;  %v410_v24 = vadd.f32 %v403_v21, %v388_v22  ;;  %v324_v25 = vpop.xlane.xlu0 %323 }
  0x85   : > { %v328_v26 = vsub.f32 %v319_v2, %v324_v25 }
  0x86   : > { %414 = vrot.lane.b32.xlu2 %v410_v24, %s679_s5 }
  0x87   : > { %v330_v27 = vmul.f32 1.442695, %v328_v26  ;;  %v383_v34 = vpop.permute.xlu1 %382 }
  0x88   : > { %v387_v37 = vmul.f32 %v383_v34, %v377_v33 }
  0x89   : > { %646 = vpow2.f32 %v330_v27 }
  0x8a   : > { %v389_v38 = vadd.f32 %v387_v37, %v375_v1 }
  0x8c   : > { %v327_v28 = vpop.xlane.xlu0 %326  ;;  %v411_v40 = vadd.f32 %v405_v39, %v389_v38  ;;  %v409_v57 = vsub.f32 %v389_v38, %v405_v39 }
  0x8d   : > { %v329_v29 = vsub.f32 %v320_v10, %v327_v28 }
  0x8f   : > { %v647_v30 = vpop.eup %646  ;;  %v332_v31 = vmul.f32 1.442695, %v329_v29 }
  0x90   : > { %v334_v32 = vsel %vm321_vm0, %v647_v30, 0.0 }
  0x91   : > { %648 = vpow2.f32 %v332_v31  ;;  %335 = vadd.xlane.f32.xlu0 %v334_v32 }
  0x97   : > { %v649_v35 = vpop.eup %648 }
  0x98   : > { %v337_v36 = vsel %vm321_vm0, %v649_v35, 0.0 }
  0x99   : > { %338 = vadd.xlane.f32.xlu1 %v337_v36 }
  0xa5   : > { %416 = vrot.lane.b32.xlu0 %v411_v40, %s679_s5 }
  0xe0   : > { %v415_v41 = vpop.permute.xlu2 %414 }
  0xe1   : > { %v421_v42 = vsel %vm420_vm1, %v408_v23, %v415_v41 }
  0xe2   : > { %424 = vst.msk [vmem:[%s747_s8] sm:$0xff] %vm423_vm2, %v421_v42 }
 0x104   : > { %v336_v43 = vpop.xlane.xlu0 %335 }
 0x105   : > { %650 = vrcp.f32 %v336_v43  ;;  %v351_v48 = vand.u32 2147483648, %v336_v43  ;;  %v349_v50 = vand.u32 2147483647, %v336_v43  ;;  %vm345_vm4 = vweird.f32 %v336_v43 }
 0x107   : > { %v352_v53 = vor.u32 1.1754944e-38, %v351_v48  ;;  %vm350_vm6 = vcmp.eq.f32.partialorder %v349_v50, 8.507059e+37 }
 0x10b   : > { %v651_v44 = vpop.eup %650 }
 0x10c   : > { %v341_v45 = vmul.f32 %v651_v44, %v336_v43  ;;  %v339_v46 = vpop.xlane.xlu1 %338  ;;  %vm346_vm3 = vweird.f32 %v651_v44 }
 0x10d   : > { %652 = vrcp.f32 %v339_v46  ;;  %vm347_vm5 = vmor %vm345_vm4, %vm346_vm3  ;;  %v366_v60 = vand.u32 2147483648, %v339_v46  ;;  %v364_v63 = vand.u32 2147483647, %v339_v46  ;;  %vm360_vm8 = vweird.f32 %v339_v46 }
 0x10e   : > { %v342_v47 = vsub.f32 1.0, %v341_v45 }
 0x10f   : > { %v367_v2 = vor.u32 1.1754944e-38, %v366_v60  ;;  %vm365_vm10 = vcmp.eq.f32.partialorder %v364_v63, 8.507059e+37 }
 0x110   : > { %v343_v49 = vmul.f32 %v651_v44, %v342_v47 }
 0x112   : > { %v344_v51 = vadd.f32 %v651_v44, %v343_v49 }
 0x113   : > { %v653_v52 = vpop.eup %652 }
 0x114   : > { %v348_v54 = vsel %vm347_vm5, %v651_v44, %v344_v51  ;;  %v356_v55 = vmul.f32 %v653_v52, %v339_v46  ;;  %vm361_vm7 = vweird.f32 %v653_v52 }
 0x115   : > { %v353_v56 = vsel %vm350_vm6, %v352_v53, %v348_v54  ;;  %vm362_vm9 = vmor %vm360_vm8, %vm361_vm7 }
 0x116   : > { %v354_v58 = vmul.f32 %v647_v30, %v353_v56  ;;  %v357_v59 = vsub.f32 1.0, %v356_v55 }
 0x117   : > { %v417_v61 = vpop.permute.xlu0 %416 }
 0x118   : > { %370 = vst.msk [vmem:[%s307_s11] sm:$0xff] %vm321_vm0, %v354_v58  ;;  %v358_v62 = vmul.f32 %v653_v52, %v357_v59  ;;  %v422_v0 = vsel %vm420_vm1, %v409_v57, %v417_v61 }
 0x119   : > { %425 = vst.msk [vmem:[%s747_s8 + $0x8] sm:$0xff] %vm423_vm2, %v422_v0 }
 0x11a   : > { %v359_v1 = vadd.f32 %v653_v52, %v358_v62 }
 0x11c   : > { %v363_v3 = vsel %vm362_vm9, %v653_v52, %v359_v1 }
 0x11d   : > { %v368_v4 = vsel %vm365_vm10, %v367_v2, %v363_v3 }
 0x11e   : > { %v369_v5 = vmul.f32 %v649_v35, %v368_v4 }
 0x120   : > { %371 = vst.msk [vmem:[%s307_s11 + $0x8] sm:$0xff] %vm321_vm0, %v369_v5 }
 0x121 PF: > { %s15_s17 = sadd.s32 1, %s676_s17   ;;  %s775_s15 = smov %s672_s16 }
 0x122   : > { %p12_p5 = scmp.ge.s32.totalorder %s15_s17, 4   ;;  %s776_s16 = smov %s778_s18 }
 0x124   :  { %14 = sbr.rel (!%p12_p5) target bundleno = 2 (0x2), region = 80 }

</bundles_post_ra>
